<compile_context>
chip_gen: v7x
topology: tpu7x:2x2x1
jax: 0.10.0
libtpu: 0.0.40
codegen_flags: <defaults>
</compile_context>

<pallas_src>
import functools

import jax
import jax.numpy as jnp
from jax.experimental import pallas as pl
from jax.experimental.pallas import tpu as pltpu


def _round_up(x, m):
    return ((x + m - 1) // m) * m


def _tpu_budgets():
    """Return (input_tile_byte_budget, vmem_limit_bytes), generation aware."""
    try:
        kind = jax.devices()[0].device_kind.lower()
    except Exception:
        kind = ""
    if "7" in kind:
        # v7x: 64 MiB VMEM per TensorCore -> 12 MiB tiles (24 MiB double-
        # buffered) and a 48 MiB scoped limit leaves comfortable headroom.
        return 12 * 1024 * 1024, 48 * 1024 * 1024
    # v5e / v6e (and other 128 MiB-VMEM parts): bigger tiles amortize the
    # ~0.35 us per-grid-step overhead against ~0.8-1.4 TB/s HBM.
    return 16 * 1024 * 1024, 80 * 1024 * 1024


def _gap_kernel_single(x_ref, o_ref, *, inv_hw):
    """Whole H*W resident in one block: single reduce, no scratch, no pl.when."""
    s = jnp.sum(x_ref[...].astype(jnp.float32), axis=-1, keepdims=True)
    o_ref[...] = (s * inv_hw).astype(o_ref.dtype)


def _gap_kernel_multi(x_ref, o_ref, acc_ref, *, inv_hw):
    """Fallback for huge H*W: accumulate partial sums across the j grid axis."""
    j = pl.program_id(1)

    @pl.when(j == 0)
    def _():
        acc_ref[...] = jnp.zeros_like(acc_ref)

    # Per-tile reduction is VALU/XLU work fully hidden under the block DMA.
    acc_ref[...] += jnp.sum(x_ref[...].astype(jnp.float32), axis=-1, keepdims=True)

    @pl.when(j == pl.num_programs(1) - 1)
    def _():
        o_ref[...] = (acc_ref[...] * inv_hw).astype(o_ref.dtype)


def global_avg_pool2d(x):
    """x: [N, C, H, W] -> [N, C, 1, 1] (matches nn.AdaptiveAvgPool2d(1))."""
    n, c, h, w = x.shape
    rows, cols = n * c, h * w
    x2d = x.reshape(rows, cols)

    itemsize = x2d.dtype.itemsize
    # Sublane packing base by dtype (f32: 8, bf16: 16, int8/fp8: 32).
    sub = {4: 8, 2: 16, 1: 32}.get(itemsize, 8)

    tile_budget, vmem_limit = _tpu_budgets()
    inv_hw = 1.0 / float(cols)

    rows_p = _round_up(rows, sub)

    if cols * itemsize * sub <= tile_budget:
        # ---- Common GAP case: the full spatial reduction fits in one block.
        col_tile = cols
        cols_p = cols
        row_tile = max(sub, (tile_budget // (cols * itemsize)) // sub * sub)
        row_tile = min(row_tile, rows_p)
        # v7x has 2 TensorCores; give the "parallel" rows axis >=2 blocks when
        # the data allows so both cores stream HBM.
        if rows_p // row_tile <= 1 and rows_p >= 2 * sub:
            row_tile = _round_up(pl.cdiv(rows_p, 2), sub)
        rows_pp = _round_up(rows_p, row_tile)
        grid = (rows_pp // row_tile,)
        multi = False
    else:
        # ---- Rare fallback: H*W too large for a single block; tile it too.
        col_tile = max(128, (tile_budget // (sub * itemsize)) // 128 * 128)
        col_tile = min(col_tile, _round_up(cols, 128))
        cols_p = _round_up(cols, col_tile)
        row_tile = max(sub, (tile_budget // (col_tile * itemsize)) // sub * sub)
        row_tile = min(row_tile, rows_p)
        rows_pp = _round_up(rows_p, row_tile)
        grid = (rows_pp // row_tile, cols_p // col_tile)
        multi = True

    # Zero-pad to tile multiples: column zeros add nothing to the sum (we
    # scale by the true 1/(H*W)); padded rows are sliced off the output.
    if (rows_pp, cols_p) != (rows, cols):
        x2d = jnp.pad(x2d, ((0, rows_pp - rows), (0, cols_p - cols)))

    cost = pl.CostEstimate(
        flops=rows_pp * cols_p,
        transcendentals=0,
        bytes_accessed=rows_pp * cols_p * itemsize + rows_pp * itemsize,
    )

    if not multi:
        out2d = pl.pallas_call(
            functools.partial(_gap_kernel_single, inv_hw=inv_hw),
            out_shape=jax.ShapeDtypeStruct((rows_pp, 1), x.dtype),
            grid_spec=pltpu.PrefetchScalarGridSpec(
                num_scalar_prefetch=0,
                grid=grid,
                in_specs=[pl.BlockSpec((row_tile, cols_p), lambda i: (i, 0))],
                out_specs=pl.BlockSpec((row_tile, 1), lambda i: (i, 0)),
            ),
            compiler_params=pltpu.CompilerParams(
                dimension_semantics=("parallel",),
                vmem_limit_bytes=vmem_limit,
            ),
            cost_estimate=cost,
        )(x2d)
    else:
        out2d = pl.pallas_call(
            functools.partial(_gap_kernel_multi, inv_hw=inv_hw),
            out_shape=jax.ShapeDtypeStruct((rows_pp, 1), x.dtype),
            grid_spec=pltpu.PrefetchScalarGridSpec(
                num_scalar_prefetch=0,
                grid=grid,
                in_specs=[pl.BlockSpec((row_tile, col_tile), lambda i, j: (i, j))],
                # Same output block across j -> resident accumulator axis.
                out_specs=pl.BlockSpec((row_tile, 1), lambda i, j: (i, 0)),
                scratch_shapes=[pltpu.VMEM((row_tile, 1), jnp.float32)],
            ),
            compiler_params=pltpu.CompilerParams(
                dimension_semantics=("parallel", "arbitrary"),
                vmem_limit_bytes=vmem_limit,
            ),
            cost_estimate=cost,
        )(x2d)

    return out2d[:rows].reshape(n, c, 1, 1)


if __name__ == "__main__":
    key = jax.random.PRNGKey(0)
    x = jax.random.normal(key, (2, 4, 16, 16), dtype=jnp.float32)

    out = global_avg_pool2d(x)
    out = jax.block_until_ready(out)

    # Reference: adaptive average pool to 1x1 == mean over spatial dims.
    ref = jnp.mean(x, axis=(2, 3), keepdims=True)
    assert out.shape == (2, 4, 1, 1), f"bad shape {out.shape}"
    assert jnp.allclose(out, ref, atol=1e-5, rtol=1e-5), "mismatch vs reference"

    print("KERNEL_OK")
</pallas_src>

<mosaic_0001>
module attributes {stable_mosaic.version = 11 : i64} {
  func.func @_gap_kernel_single(%arg0: i32, %arg1: memref<8x256xf32, #tpu.memory_space<vmem>>, %arg2: memref<8x1xf32, #tpu.memory_space<vmem>>) attributes {dimension_semantics = [#tpu.dimension_semantics<parallel>], iteration_bounds = array<i64: 1>, scalar_prefetch = 0 : i64, scratch_operands = 0 : i64, tpu.core_type = #tpu.core_type<tc>, window_params = [{transform_indices = @transform_0, window_bounds = array<i64: 8, 256>}, {transform_indices = @transform_1, window_bounds = array<i64: 8, 1>}]} {
    %c0 = arith.constant 0 : index
    %c0_0 = arith.constant 0 : index
    %0 = vector.load %arg1[%c0, %c0_0] : memref<8x256xf32, #tpu.memory_space<vmem>>, vector<8x256xf32>
    %cst = arith.constant dense<0.000000e+00> : vector<8xf32>
    %1 = vector.multi_reduction <add>, %0, %cst [1] : vector<8x256xf32> to vector<8xf32>
    %2 = vector.shape_cast %1 : vector<8xf32> to vector<8x1xf32>
    %cst_1 = arith.constant 3.906250e-03 : f32
    %3 = vector.broadcast %cst_1 : f32 to vector<8x1xf32>
    %4 = arith.mulf %2, %3 : vector<8x1xf32>
    %c0_2 = arith.constant 0 : index
    %c0_3 = arith.constant 0 : index
    %5 = vector.load %arg2[%c0_2, %c0_3] : memref<8x1xf32, #tpu.memory_space<vmem>>, vector<8x1xf32>
    tpu.vector_store %arg2[%c0_2, %c0_3], %4 {strides = array<i32>} : memref<8x1xf32, #tpu.memory_space<vmem>>, vector<8x1xf32>,
    return
  }
  func.func @transform_0(%arg0: i32) -> (i32, i32) {
    %c0_i32 = arith.constant 0 : i32
    %c0_i32_0 = arith.constant 0 : i32
    return %arg0, %c0_i32 : i32, i32
  }
  func.func @transform_1(%arg0: i32) -> (i32, i32) {
    %c0_i32 = arith.constant 0 : i32
    %c0_i32_0 = arith.constant 0 : i32
    return %arg0, %c0_i32 : i32, i32
  }
}

</mosaic_0001>

<bundles_post_ra>
// kernel: tpu_custom_call.1
= control target key start
LH: loop header
LB: loop body
LE: loop exit
PB: predicated region body
PF: predicated region fallthrough
CT: control target
= control target key end

     0   :  { %6 = vsyncpa [#allocation3], 0  ;;  %s130_s0 = inlined_call_operand.hbm [shape: f32[8,256], index: 0, kind: input, shape index: {}]   ;;  %s131_s1 = inlined_call_operand.hbm [shape: f32[8,1], index: 1, kind: output, shape index: {}]  }
   0x1   :  { %7 = vsyncpa [#allocation4], 0  ;;  %s94_s6 = smov [#allocation2]   ;;  %s46_s10 = scalar_lea.hbm %s130_s0, 256 }
   0x2   :  { %s14_s7 = sshll.u32 %s94_s6, 4  ;;  %p47_p0 = scmp.ne.s32.totalorder %s130_s0, %s46_s10  ;;  %s15_s7 = int_to_ptr.vmem [resolvable:$true] %s14_s7 }
   0x3   :  { %p50_p1 = scmp.lt.u32.totalorder %s46_s10, %s130_s0 }
   0x5   :  { %p52_p2 = pnand %p50_p1, %p47_p0 }
   0x7   :  { %55 = shalt.err (!%p52_p2)
}
   0x8   :  { %s56_s15 = scalar_lea.vmem %s15_s7, 256  ;;  %p61_p4 = scmp.lt.s32.totalorder %s15_s7, %s15_s7 }
   0x9   :  { %p57_p3 = scmp.ne.s32.totalorder %s15_s7, %s56_s15  ;;  %p62_p5 = scmp.lt.s32.totalorder %s56_s15, %s56_s15 }
   0xb   :  { %p63_p6 = por %p62_p5, %p61_p4 }
   0xd   :  { %p64_p7 = pnand %p63_p6, %p57_p3 }
   0xf   :  { %67 = shalt.err (!%p64_p7)
}
  0x10   :  { %17 = dma.hbm_to_vmem [thread:$0]  %s130_s0, 256, %s15_s7, [#allocation3]  }
  0x11   :  { %90 = dma.done.wait [#allocation3], 256  }
  0x12   :  { %91 = vsyncadd [#allocation3], 4294967040  ;;  %v21_v0 = vld [vmem:[#allocation2] sm:$0xff]  ;;  %v22_v1 = vld [vmem:[#allocation2 + $0x8] sm:$0xff]  ;;  %s95_s18 = smov [#allocation5]   ;;  %vm27_vm0 = vcmask 7168  }
  0x13   :  { %v23_v2 = vadd.f32 %v22_v1, %v21_v0  ;;  %s35_s19 = sshll.u32 %s95_s18, 4  ;;  %s36_s19 = int_to_ptr.vmem [resolvable:$true] %s35_s19 }
  0x14   :  { %s68_s20 = scalar_lea.vmem %s36_s19, 128  ;;  %p73_p9 = scmp.lt.s32.totalorder %s36_s19, %s36_s19 }
  0x15   :  { %24 = vadd.xlane.f32.xlu0 %v23_v2  ;;  %p69_p8 = scmp.ne.s32.totalorder %s36_s19, %s68_s20  ;;  %p74_p10 = scmp.lt.s32.totalorder %s68_s20, %s68_s20 }
  0x17   :  { %p75_p11 = por %p74_p10, %p73_p9 }
  0x19   :  { %p76_p12 = pnand %p75_p11, %p69_p8 }
  0xa2   :  { %v25_v3 = vpop.xlane.xlu0 %24 }
  0xa3   :  { %v26_v4 = vmul.f32 0.00390625, %v25_v3 }
  0xa5   :  { %28 = vst.msk [vmem:[#allocation5] sm:$0xff] %vm27_vm0, %v26_v4 }
  0xa6   :  { %79 = shalt.err (!%p76_p12)
}
  0xa7   :  { %s80_s22 = scalar_lea.hbm %s131_s1, 128 }
  0xa8   :  { %p81_p13 = scmp.ne.s32.totalorder %s131_s1, %s80_s22  ;;  %p84_p0 = scmp.lt.u32.totalorder %s80_s22, %s131_s1 }
  0xaa   :  { %p86_p1 = pnand %p84_p0, %p81_p13 }
  0xac   :  { %89 = shalt.err (!%p86_p1)
}
  0xad   :  { %38 = dma.vmem_to_hbm [thread:$0]  %s36_s19, 128, %s131_s1, [#allocation4]  }
  0xae   :  { %92 = dma.done.wait [#allocation4], 128  }
  0xaf   :  { %93 = vsyncadd [#allocation4], 4294967168 }
  0xb0   :  { %42 = vsyncpa [#allocation3], 1 }
  0xb1   :  { %43 = vsyncpa [#allocation4], 1 }

</bundles_post_ra>
